<compile_context>
chip_gen: v7x
topology: tpu7x:2x2x1
jax: 0.10.0
libtpu: 0.0.40
codegen_flags: <defaults>
</compile_context>

<pallas_src>
import functools

import jax
import jax.numpy as jnp
from jax.experimental import pallas as pl
from jax.experimental.pallas import tpu as pltpu


_LANE = 128
_TARGET_BLOCK_BYTES = 2 * 1024 * 1024   # ~2 MiB per block per buffer (86%+ of HBM roofline)
_MIN_GRID_STEPS = 4                     # keep >= ~2 blocks per TensorCore on v7x
_SMALL_N = 32768                        # below this, plain jnp beats pallas_call launch overhead
_VMEM_LIMIT = 32 * 1024 * 1024


def _round_up(a: int, b: int) -> int:
    return ((a + b - 1) // b) * b


def _pow_static_int(base, e: int):
    """base ** e for a static positive integer e (trace-time binary exponentiation)."""
    result = None
    acc = base
    while e > 0:
        if e & 1:
            result = acc if result is None else result * acc
        e >>= 1
        if e:
            acc = acc * acc
    return result


def _bell_kernel_int(params_ref, x_ref, o_ref, *, pow2s: int):
    """Fast path: 2*shape is a known positive integer -> VALU-only power (no EUP)."""
    center = params_ref[0]
    inv_width = params_ref[1]
    z = (x_ref[...].astype(jnp.float32) - center) * inv_width
    if pow2s % 2 == 0:
        pw = _pow_static_int(z * z, pow2s // 2)          # |z| ** (2*shape), even exponent
    else:
        pw = _pow_static_int(jnp.abs(z), pow2s)          # |z| ** (2*shape), odd exponent
    o_ref[...] = (1.0 / (1.0 + pw)).astype(o_ref.dtype)


def _bell_kernel_generic(params_ref, x_ref, o_ref):
    """Generic path: arbitrary (traced / non-integer) positive `shape`."""
    center = params_ref[0]
    inv_width = params_ref[1]
    shape = params_ref[2]
    z = (x_ref[...].astype(jnp.float32) - center) * inv_width
    z2 = z * z
    # |z| ** (2*shape) == (z*z) ** shape == exp(shape * log(z*z)).
    # At z == 0: log(0) = -inf, shape * -inf = -inf, exp(-inf) = 0, matching
    # torch's 0 ** positive == 0.  (Assumes shape > 0, the standard Bell regime.)
    pw = jnp.exp(shape * jnp.log(z2))
    o_ref[...] = (1.0 / (1.0 + pw)).astype(o_ref.dtype)


def _bell_jnp_f32(x, center, width, shape):
    """Reference / fallback in plain jnp (used for tiny inputs and ragged tails)."""
    c = jnp.asarray(center, jnp.float32)
    inv_w = 1.0 / jnp.asarray(width, jnp.float32)
    s = jnp.asarray(shape, jnp.float32)
    z = (x.astype(jnp.float32) - c) * inv_w
    return 1.0 / (1.0 + jnp.abs(z) ** (2.0 * s))


def _static_pow2s(shape):
    """Return int(2*shape) if 2*shape is a static positive integer <= 64, else None."""
    if isinstance(shape, (int, float)) and not isinstance(shape, bool):
        two_s = 2.0 * float(shape)
        if two_s > 0 and two_s == int(two_s) and int(two_s) <= 64:
            return int(two_s)
    return None


def bell_forward(x: jax.Array, center, width, shape, *, min_pallas_elems: int = _SMALL_N) -> jax.Array:
    """Elementwise generalized-bell membership, computed in a tiled Pallas kernel."""
    orig_shape = x.shape
    dtype = x.dtype
    n = x.size
    itemsize = jnp.dtype(dtype).itemsize

    # Small-input fast path: pallas_call launch overhead dominates below ~100s of KiB.
    if n < max(min_pallas_elems, _LANE):
        return _bell_jnp_f32(x, center, width, shape).astype(dtype)

    xf = x.reshape(-1)
    n_main = (n // _LANE) * _LANE          # 128-aligned prefix handled by the kernel
    ragged = n_main != n
    x_main = xf[:n_main] if ragged else xf
    rows = n_main // _LANE
    x2d = x_main.reshape(rows, _LANE)

    # Tile rows: ~2 MiB per block, multiple of the sublane packing, but keep the
    # grid at >= _MIN_GRID_STEPS steps so v7x's two TensorCores both get work.
    row_align = max(8, 32 // max(itemsize, 1))   # f32 -> 8, bf16 -> 16, int8 -> 32
    target_rows = max(row_align,
                      (_TARGET_BLOCK_BYTES // (_LANE * itemsize)) // row_align * row_align)
    quarter_rows = _round_up(pl.cdiv(rows, _MIN_GRID_STEPS), row_align)
    tile_r = max(row_align, min(target_rows, quarter_rows))
    grid = (pl.cdiv(rows, tile_r),)

    # Hoist scalar math: reciprocal of width computed once here.
    params = jnp.stack([
        jnp.asarray(center, jnp.float32),
        1.0 / jnp.asarray(width, jnp.float32),
        jnp.asarray(shape, jnp.float32),
    ])

    pow2s = _static_pow2s(shape)
    if pow2s is not None:
        kernel = functools.partial(_bell_kernel_int, pow2s=pow2s)
        transcendentals = 0
        flops = (5 + pow2s.bit_length() + 2) * n_main
    else:
        kernel = _bell_kernel_generic
        transcendentals = 2 * n_main
        flops = 6 * n_main

    out2d = pl.pallas_call(
        kernel,
        out_shape=jax.ShapeDtypeStruct((rows, _LANE), dtype),
        grid=grid,
        in_specs=[
            pl.BlockSpec(memory_space=pltpu.SMEM),             # [center, 1/width, shape]
            pl.BlockSpec((tile_r, _LANE), lambda i: (i, 0)),   # x tile
        ],
        out_specs=pl.BlockSpec((tile_r, _LANE), lambda i: (i, 0)),
        compiler_params=pltpu.CompilerParams(
            dimension_semantics=("parallel",),
            vmem_limit_bytes=_VMEM_LIMIT,
        ),
        cost_estimate=pl.CostEstimate(
            flops=flops,
            transcendentals=transcendentals,
            bytes_accessed=2 * n_main * itemsize,
        ),
    )(params, x2d)

    out_main = out2d.reshape(-1)
    if ragged:
        # TODO(synk): fold the <128-element tail into the kernel with a masked
        # partial store to avoid the concatenate round trip entirely.
        tail = _bell_jnp_f32(xf[n_main:], center, width, shape).astype(dtype)
        out = jnp.concatenate([out_main, tail])
    else:
        out = out_main
    return out.reshape(orig_shape)


if __name__ == "__main__":
    center, width, shape = 0.25, 1.5, 2.0

    def ref_fn(x, c, w, s):
        return 1.0 / (1.0 + jnp.abs((x - c) / w) ** (2.0 * s))

    # 1) Primary small demo shape, forced through the Pallas kernel (even-integer path).
    x = jax.random.normal(jax.random.PRNGKey(0), (2, 4, 16, 16), dtype=jnp.float32)
    out = jax.block_until_ready(bell_forward(x, center, width, shape, min_pallas_elems=0))
    assert out.shape == x.shape and out.dtype == x.dtype
    assert jnp.allclose(out, ref_fn(x, center, width, shape), atol=1e-5, rtol=1e-5)

    # 2) Same input through the small-input jnp fast path (default threshold).
    out_fast = jax.block_until_ready(bell_forward(x, center, width, shape))
    assert jnp.allclose(out_fast, ref_fn(x, center, width, shape), atol=1e-5, rtol=1e-5)

    # 3) Larger aligned input, half-integer shape -> odd-integer 2*shape (abs + int pow path).
    x3 = jax.random.normal(jax.random.PRNGKey(1), (8, 64, 128), dtype=jnp.float32)
    out3 = jax.block_until_ready(bell_forward(x3, center, width, 1.5))
    assert out3.shape == x3.shape and out3.dtype == x3.dtype
    assert jnp.allclose(out3, ref_fn(x3, center, width, 1.5), atol=1e-5, rtol=1e-5)

    # 4) Ragged input + truly non-integer shape -> generic exp/log path + prefix/tail split.
    x4 = jax.random.normal(jax.random.PRNGKey(2), (3, 111, 111), dtype=jnp.float32)
    out4 = jax.block_until_ready(bell_forward(x4, center, width, 1.75))
    assert out4.shape == x4.shape and out4.dtype == x4.dtype
    assert jnp.allclose(out4, ref_fn(x4, center, width, 1.75), atol=1e-5, rtol=1e-5)

    print("KERNEL_OK")
</pallas_src>

<mosaic_0001>
module attributes {stable_mosaic.version = 11 : i64} {
  func.func @_bell_kernel_int(%arg0: i32, %arg1: memref<3xf32, #tpu.memory_space<smem>>, %arg2: memref<8x128xf32, #tpu.memory_space<vmem>>, %arg3: memref<8x128xf32, #tpu.memory_space<vmem>>) attributes {dimension_semantics = [#tpu.dimension_semantics<parallel>], iteration_bounds = array<i64: 2>, scalar_prefetch = 0 : i64, scratch_operands = 0 : i64, tpu.core_type = #tpu.core_type<tc>, window_params = [{transform_indices = @transform_0, window_bounds = array<i64: 3>}, {transform_indices = @transform_1, window_bounds = array<i64: 8, 128>}, {transform_indices = @transform_2, window_bounds = array<i64: 8, 128>}]} {
    %c0 = arith.constant 0 : index
    %0 = memref.load %arg1[%c0] : memref<3xf32, #tpu.memory_space<smem>>
    %c1 = arith.constant 1 : index
    %1 = memref.load %arg1[%c1] : memref<3xf32, #tpu.memory_space<smem>>
    %c0_0 = arith.constant 0 : index
    %c0_1 = arith.constant 0 : index
    %2 = vector.load %arg2[%c0_0, %c0_1] : memref<8x128xf32, #tpu.memory_space<vmem>>, vector<8x128xf32>
    %3 = vector.broadcast %0 : f32 to vector<8x128xf32>
    %4 = arith.subf %2, %3 : vector<8x128xf32>
    %5 = vector.broadcast %1 : f32 to vector<8x128xf32>
    %6 = arith.mulf %4, %5 : vector<8x128xf32>
    %7 = arith.mulf %6, %6 : vector<8x128xf32>
    %8 = arith.mulf %7, %7 : vector<8x128xf32>
    %cst = arith.constant 1.000000e+00 : f32
    %9 = vector.broadcast %cst : f32 to vector<8x128xf32>
    %10 = arith.addf %9, %8 : vector<8x128xf32>
    %cst_2 = arith.constant 1.000000e+00 : f32
    %11 = vector.broadcast %cst_2 : f32 to vector<8x128xf32>
    %12 = arith.divf %11, %10 : vector<8x128xf32>
    %c0_3 = arith.constant 0 : index
    %c0_4 = arith.constant 0 : index
    %13 = vector.load %arg3[%c0_3, %c0_4] : memref<8x128xf32, #tpu.memory_space<vmem>>, vector<8x128xf32>
    tpu.vector_store %arg3[%c0_3, %c0_4], %12 {strides = array<i32>} : memref<8x128xf32, #tpu.memory_space<vmem>>, vector<8x128xf32>,
    return
  }
  func.func @transform_0(%arg0: i32) -> i32 {
    %c0_i32 = arith.constant 0 : i32
    %c0_i32_0 = arith.constant 0 : i32
    return %c0_i32 : i32
  }
  func.func @transform_1(%arg0: i32) -> (i32, i32) {
    %c0_i32 = arith.constant 0 : i32
    %c0_i32_0 = arith.constant 0 : i32
    return %arg0, %c0_i32 : i32, i32
  }
  func.func @transform_2(%arg0: i32) -> (i32, i32) {
    %c0_i32 = arith.constant 0 : i32
    %c0_i32_0 = arith.constant 0 : i32
    return %arg0, %c0_i32 : i32, i32
  }
}

</mosaic_0001>

<bundles_post_ra>
// kernel: tpu_custom_call.1
= control target key start
LH: loop header
LB: loop body
LE: loop exit
PB: predicated region body
PF: predicated region fallthrough
CT: control target
= control target key end

     0   :  { %7 = vsyncpa [#allocation5], 0  ;;  %s692_s0 = inlined_call_operand.hbm [shape: f32[3], index: 0, kind: input, shape index: {}]   ;;  %s693_s1 = inlined_call_operand.hbm [shape: f32[16,128], index: 1, kind: input, shape index: {}]   ;;  %s694_s2 = inlined_call_operand.hbm [shape: f32[16,128], index: 2, kind: output, shape index: {}]  }
   0x1   :  { %8 = vsyncpa [#allocation3], 0 }
   0x2   :  { %10 = vsyncpa [#allocation3 + $0x1], 0 }
   0x3   :  { %11 = vsyncpa [#allocation4], 0 }
   0x4   :  { %13 = vsyncpa [#allocation4 + $0x1], 0  ;;  %s487_s9 = smov 0   ;;  %s489_s10 = smov 0  }
   0x5   :  { %s491_s11 = smov 0   ;;  %s493_s12 = smov 0  }
   0x6 LB: > { %s508_s13 = sadd.s32 4294967295, %s467_s12   ;;  %s280_s14 = sadd.s32 4294967294, %s467_s12   ;;  %s467_s12 = sphi %s493_s12, %s715_s12   ;;  %s463_s11 = sphi %s491_s11, %s714_s11   ;;  %s459_s10 = sphi %s489_s10, %s713_s10   ;;  %s455_s9 = sphi %s487_s9, %s712_s9  }
   0x7   : > { %p60_p0 = scmp.ne.s32.totalorder %s459_s10, %s455_s9  ;;  %p695_p1 = scmp.eq.s32.totalorder %s508_s13, 0 }
   0x8   : > { %p90_p3 = scmp.eq.s32.totalorder %s280_s14, 1  ;;  %p281_p5 = scmp.ge.s32.totalorder %s467_s12, 1 }
   0x9   : > { %p517_p4 = por %p695_p1, %p60_p0  ;;  %p97_p7 = scmp.lt.s32.totalorder %s467_s12, 3 }
   0xa   : > { %p522_p6 = por %p90_p3, %p60_p0  ;;  %s533_s18 = sadd.s32 1, %s467_s12  }
   0xb   : > { %s698_s15 = scalar_select %p517_p4, 1, 0 }
   0xc   : > { %s699_s16 = scalar_select %p522_p6, 1, 0 }
   0xd   : > { %p527_p8 = pnand %p281_p5, %p97_p7  ;;  %s44_s19 = ssub.s32 %s467_s12, %s533_s18 }
   0xe   : > { %s47_s20 = sadd.s32 1, %s463_s11  ;;  %p546_p12 = scmp.eq.s32.totalorder %s44_s19, 0 }
   0xf   : > { %p303_p10 = pneg %p527_p8  ;;  %p54_p13 = scmp.ne.s32.totalorder %s463_s11, %s459_s10 }
  0x10   : > { %p55_p0 = scmp.eq.s32.totalorder %s467_s12, 0  ;;  %p316_p3 = scmp.lt.s32.totalorder %s467_s12, 2 }
  0x11   : > { %p542_p11 = pnand %p303_p10, %p695_p1  ;;  %s354_s25 = scalar_lea.hbm %s692_s0, 16 }
  0x12   : > { %p355_p5 = scmp.ne.s32.totalorder %s692_s0, %s354_s25  ;;  %p361_p1 = scmp.lt.u32.totalorder %s354_s25, %s692_s0 }
  0x13   : > { %p356_p7 = pneg %p542_p11 }
  0x15   : > { %p357_p10 = pnand %p356_p7, %p355_p5 }
  0x17   : > { %p358_p9 = pneg %p357_p10 }
  0x19   : > { %p363_p2 = pnand %p361_p1, %p358_p9 }
  0x1b   : > { %366 = shalt.err (!%p363_p2)
}
  0x1c   : > { %s469_s30 = smov [#allocation2]   ;;  %p56_p1 = por %p55_p0, %p54_p13 }
  0x1d   : > { %306 = dma.hbm_to_smem (!%p542_p11), %s692_s0, 16, %s469_s30, [#allocation5]  }
  0x1e   : > { %s573_s5 = scalar_select %p546_p12, %s463_s11, %s47_s20  }
  0x1f   : > { %p703_p2 = scmp.eq.s32.totalorder %s508_s13, 1  ;;  %s119_s7 = sand.u32 1, %s463_s11  }
  0x20   : > { %s285_s8 = sshll.u32 %s467_s12, 7  ;;  %s284_s14 = sshll.u32 %s119_s7, 3 }
  0x21   : > { %p585_p9 = por %p703_p2, %p54_p13  ;;  %s594_s23 = scalar_lea.hbm %s693_s1, %s285_s8 }
  0x22   : > { %s123_s20 = scalar_lea.vmem [#allocation6], %s284_s14  ;;  %p598_p11 = pnand %p316_p3, %p56_p1 }
  0x23   : > { %s704_s6 = scalar_select %p585_p9, 1, 0 }
  0x24   : > { %s130_s22 = sshll.u32 %s123_s20, 4  ;;  %s120_s25 = scalar_lea.sflag [#allocation3], %s119_s7  ;;  %s602_s22 = int_to_ptr.vmem [resolvable:$true] %s130_s22 }
  0x25   : > { %s367_s26 = scalar_lea.hbm %s594_s23, 128  ;;  %p369_p13 = pneg %p598_p11 }
  0x26   : > { %p368_p12 = scmp.ne.s32.totalorder %s594_s23, %s367_s26  ;;  %s372_s29 = scalar_lea.hbm %s693_s1, 256 }
  0x27   : > { %p373_p3 = scmp.lt.u32.totalorder %s594_s23, %s693_s1  ;;  %p374_p7 = scmp.lt.u32.totalorder %s372_s29, %s367_s26 }
  0x28   : > { %p370_p0 = pnand %p369_p13, %p368_p12  ;;  %p376_p1 = scmp.lt.u32.totalorder %s367_s26, %s594_s23 }
  0x29   : > { %p375_p10 = por %p374_p7, %p373_p3 }
  0x2a   : > { %p371_p5 = pneg %p370_p0 }
  0x2b   : > { %p377_p2 = por %p376_p1, %p375_p10 }
  0x2d   : > { %p378_p6 = pnand %p377_p2, %p371_p5 }
  0x2f   : > { %381 = shalt.err (!%p378_p6)
}
  0x30   : > { %s382_s4 = scalar_lea.vmem %s602_s22, 128  ;;  %s470_s7 = smov [#allocation6]  }
  0x31   : > { %p383_p12 = scmp.ne.s32.totalorder %s602_s22, %s382_s4  ;;  %s387_s8 = sshll.u32 %s470_s7, 4  ;;  %s388_s8 = int_to_ptr.vmem [resolvable:$false] %s387_s8 }
  0x32   : > { %s389_s14 = scalar_lea.vmem %s388_s8, 256  ;;  %p390_p4 = scmp.lt.s32.totalorder %s602_s22, %s388_s8 }
  0x33   : > { %p385_p0 = pnand %p383_p12, %p369_p13  ;;  %p391_p3 = scmp.lt.s32.totalorder %s389_s14, %s382_s4 }
  0x35   : > { %p386_p9 = pneg %p385_p0  ;;  %p392_p7 = por %p391_p3, %p390_p4 }
  0x37   : > { %p393_p10 = pnand %p392_p7, %p386_p9 }
  0x39   : > { %396 = shalt.err (!%p393_p10)
}
  0x3a   : > { %310 = dma.hbm_to_vmem [thread:$0]  (!%p598_p11), %s594_s23, 128, %s602_s22, %s120_s25  }
  0x3b   : > { %139 = sbr.rel (%p527_p8) target bundleno = 115 (0x73), region = 28  ;;  %p706_p6 = scmp.eq.s32.totalorder (!%p527_p8), %s508_s13, 0 }
  0x42   : > { %442 = dma.done.wait (%p706_p6), [#allocation5], 16   ;;  %p707_p13 = pmov %p706_p6 }
  0x43   : > { %s636_s19 = sand.u32 1, %s459_s10   ;;  %p708_p4 = scmp.ne.s32.totalorder %s698_s15, 0 }
  0x44   : > { %444 = vsyncadd (%p707_p13), [#allocation5], 4294967280  ;;  %s288_s21 = sshll.u32 %s636_s19, 3  ;;  %s146_s20 = scalar_lea.sflag [#allocation3], %s636_s19 }
  0x45   : > { %s149_s24 = scalar_lea.vmem [#allocation6], %s288_s21 }
  0x46   : > { %446 = dma.done.wait (%p708_p4), %s146_s20, 128  }
  0x47   : > { %448 = vsyncadd (%p708_p4), %s146_s20, 4294967168 }
  0x48   : > { %154 = sfence }
  0x49   : > { %s171_s17 = sld [smem:[#allocation2]]  ;;  %s290_s23 = sld [smem:[#allocation2 + $0x1]]  ;;  %v173_v0 = vld [vmem:[%s149_s24] sm:$0xff] }
  0x4a   : > { %s170_s22 = scalar_lea.vmem [#allocation7], %s288_s21  ;;  %s292_s26 = sshll.u32 %s508_s13, 7 }
  0x4b   : > { %s198_s25 = sshll.u32 %s170_s22, 4  ;;  %s650_s28 = scalar_lea.hbm %s694_s2, %s292_s26  ;;  %s645_s25 = int_to_ptr.vmem [resolvable:$true] %s198_s25 }
  0x4c   : > { %s185_s29 = scalar_lea.sflag [#allocation4], %s636_s19  ;;  %s397_s30 = scalar_lea.vmem %s645_s25, 128 }
  0x4d   : > { %p398_p8 = scmp.ne.s32.totalorder %s645_s25, %s397_s30  ;;  %p709_p9 = scmp.ne.s32.totalorder %s704_s6, 0 }
  0x4e   : > { %s471_s3 = smov [#allocation7]  }
  0x4f   : > { %v174_v1 = vstv %s171_s17  ;;  %v176_v3 = vstv %s290_s23  ;;  %p399_p11 = pnand %p398_p8, %p709_p9  ;;  %s401_s13 = sshll.u32 %s471_s3, 4  ;;  %s402_s13 = int_to_ptr.vmem [resolvable:$false] %s401_s13 }
  0x50   : > { %v175_v2 = vsub.f32 %v173_v0, %v174_v1  ;;  %s403_s4 = scalar_lea.vmem %s402_s13, 256  ;;  %p404_p1 = scmp.lt.s32.totalorder %s645_s25, %s402_s13 }
  0x51   : > { %p400_p5 = pneg %p399_p11  ;;  %p405_p2 = scmp.lt.s32.totalorder %s403_s4, %s397_s30 }
  0x52   : > { %v177_v4 = vmul.f32 %v176_v3, %v175_v2 }
  0x53   : > { %p406_p12 = por %p405_p2, %p404_p1 }
  0x54   : > { %v178_v5 = vmul.f32 %v177_v4, %v177_v4 }
  0x55   : > { %p407_p0 = pnand %p406_p12, %p400_p5 }
  0x56   : > { %v179_v6 = vmul.f32 %v178_v5, %v178_v5 }
  0x58   : > { %v180_v7 = vadd.f32 1.0, %v179_v6 }
  0x5a   : > { %352 = vrcp.f32 %v180_v7 }
  0x64   : > { %v353_v8 = vpop.eup %352 }
  0x65   : > { %183 = vst [vmem:[%s170_s22] sm:$0xff] %v353_v8 }
  0x66   : > { %410 = shalt.err (!%p407_p0)
}
  0x67   : > { %s411_s7 = scalar_lea.hbm %s650_s28, 128  ;;  %s415_s19 = scalar_lea.hbm %s694_s2, 256 }
  0x68   : > { %p412_p3 = scmp.ne.s32.totalorder %s650_s28, %s411_s7  ;;  %p416_p6 = scmp.lt.u32.totalorder %s650_s28, %s694_s2 }
  0x69   : > { %p417_p13 = scmp.lt.u32.totalorder %s415_s19, %s411_s7  ;;  %p419_p8 = scmp.lt.u32.totalorder %s411_s7, %s650_s28 }
  0x6a   : > { %p413_p7 = pnand %p412_p3, %p709_p9 }
  0x6b   : > { %p418_p4 = por %p417_p13, %p416_p6 }
  0x6c   : > { %p414_p10 = pneg %p413_p7 }
  0x6d   : > { %p420_p11 = por %p419_p8, %p418_p4 }
  0x6f   : > { %p421_p5 = pnand %p420_p11, %p414_p10 }
  0x71   : > { %424 = shalt.err (!%p421_p5)
}
  0x72   : > { %301 = dma.vmem_to_hbm [thread:$0]  (%p709_p9), %s645_s25, 128, %s650_s28, %s185_s29  }
  0x73 PF: > { %s210_s24 = sand.u32 1, %s455_s9   ;;  %p710_p1 = scmp.ne.s32.totalorder %s699_s16, 0 }
  0x74   : > { %p711_p2 = scmp.ge.s32.totalorder %s467_s12, 2  ;;  %s211_s17 = scalar_lea.sflag [#allocation4], %s210_s24 }
  0x76   : > { %p312_p12 = pnand %p711_p2, %p710_p1 }
  0x78   : > { %450 = dma.done.wait (!%p312_p12), %s211_s17, 128  }
  0x79   : > { %452 = vsyncadd (!%p312_p12), %s211_s17, 4294967168  ;;  %p16_p0 = scmp.ge.s32.totalorder %s533_s18, 4   ;;  %s712_s9 = smov %s459_s10 }
  0x7a   : > { %s713_s10 = smov %s463_s11  ;;  %s714_s11 = smov %s573_s5 }
  0x7b   : > { %s715_s12 = smov %s533_s18  ;;  %18 = sbr.rel (!%p16_p0) target bundleno = 6 (0x6), region = 78 }
  0x82   :  { %216 = vsyncpa [#allocation3], 1 }
  0x83   :  { %218 = vsyncpa [#allocation3 + $0x1], 1 }
  0x84   :  { %219 = vsyncpa [#allocation4], 1 }
  0x85   :  { %221 = vsyncpa [#allocation4 + $0x1], 1 }
  0x86   :  { %222 = vsyncpa [#allocation5], 1 }
  0x87   :  { %224 = vsyncpa [#allocation5 + $0x1], 1 }

</bundles_post_ra>
